<compile_context>
chip_gen: v7x
topology: tpu7x:2x2x1
jax: 0.10.0
libtpu: 0.0.40
codegen_flags: <defaults>
</compile_context>

<pallas_src>
import functools

import jax
import jax.numpy as jnp
from jax.experimental import pallas as pl
from jax.experimental.pallas import tpu as pltpu


_TARGET_BLOCK_BYTES = 6 * 1024 * 1024   # in + out HBM bytes moved per grid step
_MAX_BATCH_FOLD = 8                      # cap on python-unrolled batch rows per block


def _outconv_kernel(w_ref, b_ref, x_ref, o_ref, *, cin, cout, tn, packed):
    """1x1 conv on one block, fully unrolled on the VPU (no MXU).

    w_ref : (cout, cin) f32 in SMEM
    b_ref : (cout,)     f32 in SMEM
    packed=True : x_ref (tn, cin, ths, 128), o_ref (tn, cout, ths, 128)
    packed=False: x_ref (tn, cin, thw),      o_ref (tn, cout, thw)
    """
    for n in range(tn):
        for co in range(cout):
            if packed:
                acc = x_ref[n, 0, :, :].astype(jnp.float32) * w_ref[co, 0]
                for ci in range(1, cin):
                    acc = acc + x_ref[n, ci, :, :].astype(jnp.float32) * w_ref[co, ci]
                o_ref[n, co, :, :] = (acc + b_ref[co]).astype(o_ref.dtype)
            else:
                acc = x_ref[n, 0:1, :].astype(jnp.float32) * w_ref[co, 0]
                for ci in range(1, cin):
                    acc = acc + x_ref[n, ci:ci + 1, :].astype(jnp.float32) * w_ref[co, ci]
                o_ref[n, co:co + 1, :] = (acc + b_ref[co]).astype(o_ref.dtype)


def outconv_pallas(x_nchw, weight, bias):
    """Forward of nn.Conv2d(in_ch, out_ch, kernel_size=1).

    x_nchw : (N, Cin, H, W)
    weight : (Cout, Cin, 1, 1)
    bias   : (Cout,)
    returns: (N, Cout, H, W)
    """
    N, Cin, H, W = x_nchw.shape
    Cout = weight.shape[0]
    HW = H * W

    itemsize = jnp.dtype(x_nchw.dtype).itemsize
    per_px_bytes = (Cin + Cout) * itemsize          # in + out bytes per pixel
    sub_mult = 8 if itemsize >= 4 else (16 if itemsize == 2 else 32)

    # Free reshapes only — no transposes, no HBM copies.
    w_mat = weight.reshape(Cout, Cin).astype(jnp.float32)
    b_vec = bias.reshape(Cout).astype(jnp.float32)

    packed = (HW % 128 == 0)

    if packed:
        # Spatial axis packed onto sublanes: (N, Cin, S, 128), S = HW // 128.
        S = HW // 128
        x_in = x_nchw.reshape(N, Cin, S, 128)
        row_bytes = per_px_bytes * 128
        rows_budget = max(sub_mult, _TARGET_BLOCK_BYTES // row_bytes)
        if S <= rows_budget:
            ths = S                                    # full extent -> always legal
            tn = int(min(N, max(1, rows_budget // S), _MAX_BATCH_FOLD))
        else:
            ths = int(min(S, (rows_budget // sub_mult) * sub_mult))
            tn = 1
        grid = (pl.cdiv(N, tn), pl.cdiv(S, ths))
        in_spec = pl.BlockSpec((tn, Cin, ths, 128), lambda n, j: (n, 0, j, 0))
        out_spec = pl.BlockSpec((tn, Cout, ths, 128), lambda n, j: (n, 0, j, 0))
        out_flat_shape = (N, Cout, S, 128)
        spatial_elems = ths * 128
    else:
        # Fallback: lane-dense rows, channels on sublanes (HW not a multiple of 128).
        x_in = x_nchw.reshape(N, Cin, HW)
        if per_px_bytes * HW <= _TARGET_BLOCK_BYTES:
            thw = HW                                   # full extent -> always legal
            tn = int(min(N, max(1, _TARGET_BLOCK_BYTES // (per_px_bytes * HW)),
                         _MAX_BATCH_FOLD))
        else:
            lanes_budget = (_TARGET_BLOCK_BYTES // (per_px_bytes * 128)) * 128
            thw = int(max(128, min(HW, lanes_budget)))
            tn = 1
        grid = (pl.cdiv(N, tn), pl.cdiv(HW, thw))
        in_spec = pl.BlockSpec((tn, Cin, thw), lambda n, j: (n, 0, j))
        out_spec = pl.BlockSpec((tn, Cout, thw), lambda n, j: (n, 0, j))
        out_flat_shape = (N, Cout, HW)
        spatial_elems = thw

    # Double-buffered in/out blocks + a few f32 elementwise-temp slabs + headroom.
    in_block_bytes = tn * Cin * spatial_elems * itemsize
    out_block_bytes = tn * Cout * spatial_elems * itemsize
    vmem_need = 2 * (in_block_bytes + out_block_bytes) + 8 * spatial_elems * 4 + (2 << 20)
    vmem_limit = int(min(max(vmem_need, 16 << 20), 64 << 20))   # fits v7x's 64 MiB too

    cost = pl.CostEstimate(
        flops=2 * N * HW * Cin * Cout,
        transcendentals=0,
        bytes_accessed=itemsize * (N * Cin * HW + N * Cout * HW) + 4 * (Cin * Cout + Cout),
    )

    kernel = functools.partial(_outconv_kernel, cin=Cin, cout=Cout, tn=tn, packed=packed)

    out = pl.pallas_call(
        kernel,
        out_shape=jax.ShapeDtypeStruct(out_flat_shape, x_nchw.dtype),
        grid_spec=pltpu.PrefetchScalarGridSpec(
            num_scalar_prefetch=0,
            grid=grid,
            in_specs=[
                # Tiny parameters live in SMEM; read as scalars in the kernel.
                pl.BlockSpec(memory_space=pltpu.MemorySpace.SMEM),   # weight (Cout, Cin)
                pl.BlockSpec(memory_space=pltpu.MemorySpace.SMEM),   # bias   (Cout,)
                in_spec,                                             # activations
            ],
            out_specs=out_spec,
        ),
        compiler_params=pltpu.CompilerParams(
            dimension_semantics=("parallel", "parallel"),
            vmem_limit_bytes=vmem_limit,
        ),
        cost_estimate=cost,
    )(w_mat, b_vec, x_in)

    return out.reshape(N, Cout, H, W)


if __name__ == "__main__":
    # Small shapes consistent with the module: outconv(in_ch=4, out_ch=3)
    N, Cin, H, W = 2, 4, 16, 16
    Cout = 3

    key = jax.random.PRNGKey(0)
    kx, kw, kb = jax.random.split(key, 3)

    x = jax.random.normal(kx, (N, Cin, H, W), dtype=jnp.float32)
    # PyTorch-like uniform(-1/sqrt(fan_in), 1/sqrt(fan_in)) init, deterministic.
    bound = 1.0 / (Cin ** 0.5)
    weight = jax.random.uniform(kw, (Cout, Cin, 1, 1), minval=-bound, maxval=bound,
                                dtype=jnp.float32)
    bias = jax.random.uniform(kb, (Cout,), minval=-bound, maxval=bound,
                              dtype=jnp.float32)

    y = outconv_pallas(x, weight, bias)
    y = jax.block_until_ready(y)

    # Reference: plain-JAX 1x1 conv.
    y_ref = (jnp.einsum("nchw,oc->nohw", x, weight.reshape(Cout, Cin))
             + bias[None, :, None, None])
    assert y.shape == (N, Cout, H, W)
    assert jnp.allclose(y, y_ref, atol=1e-5, rtol=1e-5)

    # Also exercise the non-packed fallback path (HW % 128 != 0) for safety.
    Hf, Wf = 10, 10
    xf = jax.random.normal(kx, (N, Cin, Hf, Wf), dtype=jnp.float32)
    yf = jax.block_until_ready(outconv_pallas(xf, weight, bias))
    yf_ref = (jnp.einsum("nchw,oc->nohw", xf, weight.reshape(Cout, Cin))
              + bias[None, :, None, None])
    assert jnp.allclose(yf, yf_ref, atol=1e-5, rtol=1e-5)

    print("KERNEL_OK")
</pallas_src>

<mosaic_0001>
module attributes {stable_mosaic.version = 11 : i64} {
  func.func @_outconv_kernel(%arg0: i32, %arg1: i32, %arg2: memref<3x4xf32, #tpu.memory_space<smem>>, %arg3: memref<3xf32, #tpu.memory_space<smem>>, %arg4: memref<2x4x2x128xf32, #tpu.memory_space<vmem>>, %arg5: memref<2x3x2x128xf32, #tpu.memory_space<vmem>>) attributes {dimension_semantics = [#tpu.dimension_semantics<parallel>, #tpu.dimension_semantics<parallel>], iteration_bounds = array<i64: 1, 1>, scalar_prefetch = 0 : i64, scratch_operands = 0 : i64, tpu.core_type = #tpu.core_type<tc>, window_params = [{transform_indices = @transform_0, window_bounds = array<i64: 3, 4>}, {transform_indices = @transform_1, window_bounds = array<i64: 3>}, {transform_indices = @transform_2, window_bounds = array<i64: 2, 4, 2, 128>}, {transform_indices = @transform_3, window_bounds = array<i64: 2, 3, 2, 128>}]} {
    %c0 = arith.constant 0 : index
    %c0_0 = arith.constant 0 : index
    %c0_1 = arith.constant 0 : index
    %c0_2 = arith.constant 0 : index
    %0 = vector.load %arg4[%c0, %c0_0, %c0_1, %c0_2] : memref<2x4x2x128xf32, #tpu.memory_space<vmem>>, vector<1x1x2x128xf32>
    %1 = vector.shape_cast %0 : vector<1x1x2x128xf32> to vector<2x128xf32>
    %c0_3 = arith.constant 0 : index
    %c0_4 = arith.constant 0 : index
    %2 = memref.load %arg2[%c0_3, %c0_4] : memref<3x4xf32, #tpu.memory_space<smem>>
    %3 = vector.broadcast %2 : f32 to vector<2x128xf32>
    %4 = arith.mulf %1, %3 : vector<2x128xf32>
    %c0_5 = arith.constant 0 : index
    %c1 = arith.constant 1 : index
    %c0_6 = arith.constant 0 : index
    %c0_7 = arith.constant 0 : index
    %5 = vector.load %arg4[%c0_5, %c1, %c0_6, %c0_7] : memref<2x4x2x128xf32, #tpu.memory_space<vmem>>, vector<1x1x2x128xf32>
    %6 = vector.shape_cast %5 : vector<1x1x2x128xf32> to vector<2x128xf32>
    %c0_8 = arith.constant 0 : index
    %c1_9 = arith.constant 1 : index
    %7 = memref.load %arg2[%c0_8, %c1_9] : memref<3x4xf32, #tpu.memory_space<smem>>
    %8 = vector.broadcast %7 : f32 to vector<2x128xf32>
    %9 = arith.mulf %6, %8 : vector<2x128xf32>
    %10 = arith.addf %4, %9 : vector<2x128xf32>
    %c0_10 = arith.constant 0 : index
    %c2 = arith.constant 2 : index
    %c0_11 = arith.constant 0 : index
    %c0_12 = arith.constant 0 : index
    %11 = vector.load %arg4[%c0_10, %c2, %c0_11, %c0_12] : memref<2x4x2x128xf32, #tpu.memory_space<vmem>>, vector<1x1x2x128xf32>
    %12 = vector.shape_cast %11 : vector<1x1x2x128xf32> to vector<2x128xf32>
    %c0_13 = arith.constant 0 : index
    %c2_14 = arith.constant 2 : index
    %13 = memref.load %arg2[%c0_13, %c2_14] : memref<3x4xf32, #tpu.memory_space<smem>>
    %14 = vector.broadcast %13 : f32 to vector<2x128xf32>
    %15 = arith.mulf %12, %14 : vector<2x128xf32>
    %16 = arith.addf %10, %15 : vector<2x128xf32>
    %c0_15 = arith.constant 0 : index
    %c3 = arith.constant 3 : index
    %c0_16 = arith.constant 0 : index
    %c0_17 = arith.constant 0 : index
    %17 = vector.load %arg4[%c0_15, %c3, %c0_16, %c0_17] : memref<2x4x2x128xf32, #tpu.memory_space<vmem>>, vector<1x1x2x128xf32>
    %18 = vector.shape_cast %17 : vector<1x1x2x128xf32> to vector<2x128xf32>
    %c0_18 = arith.constant 0 : index
    %c3_19 = arith.constant 3 : index
    %19 = memref.load %arg2[%c0_18, %c3_19] : memref<3x4xf32, #tpu.memory_space<smem>>
    %20 = vector.broadcast %19 : f32 to vector<2x128xf32>
    %21 = arith.mulf %18, %20 : vector<2x128xf32>
    %22 = arith.addf %16, %21 : vector<2x128xf32>
    %c0_20 = arith.constant 0 : index
    %23 = memref.load %arg3[%c0_20] : memref<3xf32, #tpu.memory_space<smem>>
    %24 = vector.broadcast %23 : f32 to vector<2x128xf32>
    %25 = arith.addf %22, %24 : vector<2x128xf32>
    %c0_21 = arith.constant 0 : index
    %c0_22 = arith.constant 0 : index
    %c0_23 = arith.constant 0 : index
    %c0_24 = arith.constant 0 : index
    %26 = vector.load %arg5[%c0_21, %c0_22, %c0_23, %c0_24] : memref<2x3x2x128xf32, #tpu.memory_space<vmem>>, vector<1x1x2x128xf32>
    %27 = vector.shape_cast %26 : vector<1x1x2x128xf32> to vector<2x128xf32>
    %28 = vector.shape_cast %25 : vector<2x128xf32> to vector<1x1x2x128xf32>
    tpu.vector_store %arg5[%c0_21, %c0_22, %c0_23, %c0_24], %28 {strides = array<i32>} : memref<2x3x2x128xf32, #tpu.memory_space<vmem>>, vector<1x1x2x128xf32>,
    %c0_25 = arith.constant 0 : index
    %c0_26 = arith.constant 0 : index
    %c0_27 = arith.constant 0 : index
    %c0_28 = arith.constant 0 : index
    %29 = vector.load %arg4[%c0_25, %c0_26, %c0_27, %c0_28] : memref<2x4x2x128xf32, #tpu.memory_space<vmem>>, vector<1x1x2x128xf32>
    %30 = vector.shape_cast %29 : vector<1x1x2x128xf32> to vector<2x128xf32>
    %c1_29 = arith.constant 1 : index
    %c0_30 = arith.constant 0 : index
    %31 = memref.load %arg2[%c1_29, %c0_30] : memref<3x4xf32, #tpu.memory_space<smem>>
    %32 = vector.broadcast %31 : f32 to vector<2x128xf32>
    %33 = arith.mulf %30, %32 : vector<2x128xf32>
    %c0_31 = arith.constant 0 : index
    %c1_32 = arith.constant 1 : index
    %c0_33 = arith.constant 0 : index
    %c0_34 = arith.constant 0 : index
    %34 = vector.load %arg4[%c0_31, %c1_32, %c0_33, %c0_34] : memref<2x4x2x128xf32, #tpu.memory_space<vmem>>, vector<1x1x2x128xf32>
    %35 = vector.shape_cast %34 : vector<1x1x2x128xf32> to vector<2x128xf32>
    %c1_35 = arith.constant 1 : index
    %c1_36 = arith.constant 1 : index
    %36 = memref.load %arg2[%c1_35, %c1_36] : memref<3x4xf32, #tpu.memory_space<smem>>
    %37 = vector.broadcast %36 : f32 to vector<2x128xf32>
    %38 = arith.mulf %35, %37 : vector<2x128xf32>
    %39 = arith.addf %33, %38 : vector<2x128xf32>
    %c0_37 = arith.constant 0 : index
    %c2_38 = arith.constant 2 : index
    %c0_39 = arith.constant 0 : index
    %c0_40 = arith.constant 0 : index
    %40 = vector.load %arg4[%c0_37, %c2_38, %c0_39, %c0_40] : memref<2x4x2x128xf32, #tpu.memory_space<vmem>>, vector<1x1x2x128xf32>
    %41 = vector.shape_cast %40 : vector<1x1x2x128xf32> to vector<2x128xf32>
    %c1_41 = arith.constant 1 : index
    %c2_42 = arith.constant 2 : index
    %42 = memref.load %arg2[%c1_41, %c2_42] : memref<3x4xf32, #tpu.memory_space<smem>>
    %43 = vector.broadcast %42 : f32 to vector<2x128xf32>
    %44 = arith.mulf %41, %43 : vector<2x128xf32>
    %45 = arith.addf %39, %44 : vector<2x128xf32>
    %c0_43 = arith.constant 0 : index
    %c3_44 = arith.constant 3 : index
    %c0_45 = arith.constant 0 : index
    %c0_46 = arith.constant 0 : index
    %46 = vector.load %arg4[%c0_43, %c3_44, %c0_45, %c0_46] : memref<2x4x2x128xf32, #tpu.memory_space<vmem>>, vector<1x1x2x128xf32>
    %47 = vector.shape_cast %46 : vector<1x1x2x128xf32> to vector<2x128xf32>
    %c1_47 = arith.constant 1 : index
    %c3_48 = arith.constant 3 : index
    %48 = memref.load %arg2[%c1_47, %c3_48] : memref<3x4xf32, #tpu.memory_space<smem>>
    %49 = vector.broadcast %48 : f32 to vector<2x128xf32>
    %50 = arith.mulf %47, %49 : vector<2x128xf32>
    %51 = arith.addf %45, %50 : vector<2x128xf32>
    %c1_49 = arith.constant 1 : index
    %52 = memref.load %arg3[%c1_49] : memref<3xf32, #tpu.memory_space<smem>>
    %53 = vector.broadcast %52 : f32 to vector<2x128xf32>
    %54 = arith.addf %51, %53 : vector<2x128xf32>
    %c0_50 = arith.constant 0 : index
    %c1_51 = arith.constant 1 : index
    %c0_52 = arith.constant 0 : index
    %c0_53 = arith.constant 0 : index
    %55 = vector.load %arg5[%c0_50, %c1_51, %c0_52, %c0_53] : memref<2x3x2x128xf32, #tpu.memory_space<vmem>>, vector<1x1x2x128xf32>
    %56 = vector.shape_cast %55 : vector<1x1x2x128xf32> to vector<2x128xf32>
    %57 = vector.shape_cast %54 : vector<2x128xf32> to vector<1x1x2x128xf32>
    tpu.vector_store %arg5[%c0_50, %c1_51, %c0_52, %c0_53], %57 {strides = array<i32>} : memref<2x3x2x128xf32, #tpu.memory_space<vmem>>, vector<1x1x2x128xf32>,
    %c0_54 = arith.constant 0 : index
    %c0_55 = arith.constant 0 : index
    %c0_56 = arith.constant 0 : index
    %c0_57 = arith.constant 0 : index
    %58 = vector.load %arg4[%c0_54, %c0_55, %c0_56, %c0_57] : memref<2x4x2x128xf32, #tpu.memory_space<vmem>>, vector<1x1x2x128xf32>
    %59 = vector.shape_cast %58 : vector<1x1x2x128xf32> to vector<2x128xf32>
    %c2_58 = arith.constant 2 : index
    %c0_59 = arith.constant 0 : index
    %60 = memref.load %arg2[%c2_58, %c0_59] : memref<3x4xf32, #tpu.memory_space<smem>>
    %61 = vector.broadcast %60 : f32 to vector<2x128xf32>
    %62 = arith.mulf %59, %61 : vector<2x128xf32>
    %c0_60 = arith.constant 0 : index
    %c1_61 = arith.constant 1 : index
    %c0_62 = arith.constant 0 : index
    %c0_63 = arith.constant 0 : index
    %63 = vector.load %arg4[%c0_60, %c1_61, %c0_62, %c0_63] : memref<2x4x2x128xf32, #tpu.memory_space<vmem>>, vector<1x1x2x128xf32>
    %64 = vector.shape_cast %63 : vector<1x1x2x128xf32> to vector<2x128xf32>
    %c2_64 = arith.constant 2 : index
    %c1_65 = arith.constant 1 : index
    %65 = memref.load %arg2[%c2_64, %c1_65] : memref<3x4xf32, #tpu.memory_space<smem>>
    %66 = vector.broadcast %65 : f32 to vector<2x128xf32>
    %67 = arith.mulf %64, %66 : vector<2x128xf32>
    %68 = arith.addf %62, %67 : vector<2x128xf32>
    %c0_66 = arith.constant 0 : index
    %c2_67 = arith.constant 2 : index
    %c0_68 = arith.constant 0 : index
    %c0_69 = arith.constant 0 : index
    %69 = vector.load %arg4[%c0_66, %c2_67, %c0_68, %c0_69] : memref<2x4x2x128xf32, #tpu.memory_space<vmem>>, vector<1x1x2x128xf32>
    %70 = vector.shape_cast %69 : vector<1x1x2x128xf32> to vector<2x128xf32>
    %c2_70 = arith.constant 2 : index
    %c2_71 = arith.constant 2 : index
    %71 = memref.load %arg2[%c2_70, %c2_71] : memref<3x4xf32, #tpu.memory_space<smem>>
    %72 = vector.broadcast %71 : f32 to vector<2x128xf32>
    %73 = arith.mulf %70, %72 : vector<2x128xf32>
    %74 = arith.addf %68, %73 : vector<2x128xf32>
    %c0_72 = arith.constant 0 : index
    %c3_73 = arith.constant 3 : index
    %c0_74 = arith.constant 0 : index
    %c0_75 = arith.constant 0 : index
    %75 = vector.load %arg4[%c0_72, %c3_73, %c0_74, %c0_75] : memref<2x4x2x128xf32, #tpu.memory_space<vmem>>, vector<1x1x2x128xf32>
    %76 = vector.shape_cast %75 : vector<1x1x2x128xf32> to vector<2x128xf32>
    %c2_76 = arith.constant 2 : index
    %c3_77 = arith.constant 3 : index
    %77 = memref.load %arg2[%c2_76, %c3_77] : memref<3x4xf32, #tpu.memory_space<smem>>
    %78 = vector.broadcast %77 : f32 to vector<2x128xf32>
    %79 = arith.mulf %76, %78 : vector<2x128xf32>
    %80 = arith.addf %74, %79 : vector<2x128xf32>
    %c2_78 = arith.constant 2 : index
    %81 = memref.load %arg3[%c2_78] : memref<3xf32, #tpu.memory_space<smem>>
    %82 = vector.broadcast %81 : f32 to vector<2x128xf32>
    %83 = arith.addf %80, %82 : vector<2x128xf32>
    %c0_79 = arith.constant 0 : index
    %c2_80 = arith.constant 2 : index
    %c0_81 = arith.constant 0 : index
    %c0_82 = arith.constant 0 : index
    %84 = vector.load %arg5[%c0_79, %c2_80, %c0_81, %c0_82] : memref<2x3x2x128xf32, #tpu.memory_space<vmem>>, vector<1x1x2x128xf32>
    %85 = vector.shape_cast %84 : vector<1x1x2x128xf32> to vector<2x128xf32>
    %86 = vector.shape_cast %83 : vector<2x128xf32> to vector<1x1x2x128xf32>
    tpu.vector_store %arg5[%c0_79, %c2_80, %c0_81, %c0_82], %86 {strides = array<i32>} : memref<2x3x2x128xf32, #tpu.memory_space<vmem>>, vector<1x1x2x128xf32>,
    %c1_83 = arith.constant 1 : index
    %c0_84 = arith.constant 0 : index
    %c0_85 = arith.constant 0 : index
    %c0_86 = arith.constant 0 : index
    %87 = vector.load %arg4[%c1_83, %c0_84, %c0_85, %c0_86] : memref<2x4x2x128xf32, #tpu.memory_space<vmem>>, vector<1x1x2x128xf32>
    %88 = vector.shape_cast %87 : vector<1x1x2x128xf32> to vector<2x128xf32>
    %c0_87 = arith.constant 0 : index
    %c0_88 = arith.constant 0 : index
    %89 = memref.load %arg2[%c0_87, %c0_88] : memref<3x4xf32, #tpu.memory_space<smem>>
    %90 = vector.broadcast %89 : f32 to vector<2x128xf32>
    %91 = arith.mulf %88, %90 : vector<2x128xf32>
    %c1_89 = arith.constant 1 : index
    %c1_90 = arith.constant 1 : index
    %c0_91 = arith.constant 0 : index
    %c0_92 = arith.constant 0 : index
    %92 = vector.load %arg4[%c1_89, %c1_90, %c0_91, %c0_92] : memref<2x4x2x128xf32, #tpu.memory_space<vmem>>, vector<1x1x2x128xf32>
    %93 = vector.shape_cast %92 : vector<1x1x2x128xf32> to vector<2x128xf32>
    %c0_93 = arith.constant 0 : index
    %c1_94 = arith.constant 1 : index
    %94 = memref.load %arg2[%c0_93, %c1_94] : memref<3x4xf32, #tpu.memory_space<smem>>
    %95 = vector.broadcast %94 : f32 to vector<2x128xf32>
    %96 = arith.mulf %93, %95 : vector<2x128xf32>
    %97 = arith.addf %91, %96 : vector<2x128xf32>
    %c1_95 = arith.constant 1 : index
    %c2_96 = arith.constant 2 : index
    %c0_97 = arith.constant 0 : index
    %c0_98 = arith.constant 0 : index
    %98 = vector.load %arg4[%c1_95, %c2_96, %c0_97, %c0_98] : memref<2x4x2x128xf32, #tpu.memory_space<vmem>>, vector<1x1x2x128xf32>
    %99 = vector.shape_cast %98 : vector<1x1x2x128xf32> to vector<2x128xf32>
    %c0_99 = arith.constant 0 : index
    %c2_100 = arith.constant 2 : index
    %100 = memref.load %arg2[%c0_99, %c2_100] : memref<3x4xf32, #tpu.memory_space<smem>>
    %101 = vector.broadcast %100 : f32 to vector<2x128xf32>
    %102 = arith.mulf %99, %101 : vector<2x128xf32>
    %103 = arith.addf %97, %102 : vector<2x128xf32>
    %c1_101 = arith.constant 1 : index
    %c3_102 = arith.constant 3 : index
    %c0_103 = arith.constant 0 : index
    %c0_104 = arith.constant 0 : index
    %104 = vector.load %arg4[%c1_101, %c3_102, %c0_103, %c0_104] : memref<2x4x2x128xf32, #tpu.memory_space<vmem>>, vector<1x1x2x128xf32>
    %105 = vector.shape_cast %104 : vector<1x1x2x128xf32> to vector<2x128xf32>
    %c0_105 = arith.constant 0 : index
    %c3_106 = arith.constant 3 : index
    %106 = memref.load %arg2[%c0_105, %c3_106] : memref<3x4xf32, #tpu.memory_space<smem>>
    %107 = vector.broadcast %106 : f32 to vector<2x128xf32>
    %108 = arith.mulf %105, %107 : vector<2x128xf32>
    %109 = arith.addf %103, %108 : vector<2x128xf32>
    %c0_107 = arith.constant 0 : index
    %110 = memref.load %arg3[%c0_107] : memref<3xf32, #tpu.memory_space<smem>>
    %111 = vector.broadcast %110 : f32 to vector<2x128xf32>
    %112 = arith.addf %109, %111 : vector<2x128xf32>
    %c1_108 = arith.constant 1 : index
    %c0_109 = arith.constant 0 : index
    %c0_110 = arith.constant 0 : index
    %c0_111 = arith.constant 0 : index
    %113 = vector.load %arg5[%c1_108, %c0_109, %c0_110, %c0_111] : memref<2x3x2x128xf32, #tpu.memory_space<vmem>>, vector<1x1x2x128xf32>
    %114 = vector.shape_cast %113 : vector<1x1x2x128xf32> to vector<2x128xf32>
    %115 = vector.shape_cast %112 : vector<2x128xf32> to vector<1x1x2x128xf32>
    tpu.vector_store %arg5[%c1_108, %c0_109, %c0_110, %c0_111], %115 {strides = array<i32>} : memref<2x3x2x128xf32, #tpu.memory_space<vmem>>, vector<1x1x2x128xf32>,
    %c1_112 = arith.constant 1 : index
    %c0_113 = arith.constant 0 : index
    %c0_114 = arith.constant 0 : index
    %c0_115 = arith.constant 0 : index
    %116 = vector.load %arg4[%c1_112, %c0_113, %c0_114, %c0_115] : memref<2x4x2x128xf32, #tpu.memory_space<vmem>>, vector<1x1x2x128xf32>
    %117 = vector.shape_cast %116 : vector<1x1x2x128xf32> to vector<2x128xf32>
    %c1_116 = arith.constant 1 : index
    %c0_117 = arith.constant 0 : index
    %118 = memref.load %arg2[%c1_116, %c0_117] : memref<3x4xf32, #tpu.memory_space<smem>>
    %119 = vector.broadcast %118 : f32 to vector<2x128xf32>
    %120 = arith.mulf %117, %119 : vector<2x128xf32>
    %c1_118 = arith.constant 1 : index
    %c1_119 = arith.constant 1 : index
    %c0_120 = arith.constant 0 : index
    %c0_121 = arith.constant 0 : index
    %121 = vector.load %arg4[%c1_118, %c1_119, %c0_120, %c0_121] : memref<2x4x2x128xf32, #tpu.memory_space<vmem>>, vector<1x1x2x128xf32>
    %122 = vector.shape_cast %121 : vector<1x1x2x128xf32> to vector<2x128xf32>
    %c1_122 = arith.constant 1 : index
    %c1_123 = arith.constant 1 : index
    %123 = memref.load %arg2[%c1_122, %c1_123] : memref<3x4xf32, #tpu.memory_space<smem>>
    %124 = vector.broadcast %123 : f32 to vector<2x128xf32>
    %125 = arith.mulf %122, %124 : vector<2x128xf32>
    %126 = arith.addf %120, %125 : vector<2x128xf32>
    %c1_124 = arith.constant 1 : index
    %c2_125 = arith.constant 2 : index
    %c0_126 = arith.constant 0 : index
    %c0_127 = arith.constant 0 : index
    %127 = vector.load %arg4[%c1_124, %c2_125, %c0_126, %c0_127] : memref<2x4x2x128xf32, #tpu.memory_space<vmem>>, vector<1x1x2x128xf32>
    %128 = vector.shape_cast %127 : vector<1x1x2x128xf32> to vector<2x128xf32>
    %c1_128 = arith.constant 1 : index
    %c2_129 = arith.constant 2 : index
    %129 = memref.load %arg2[%c1_128, %c2_129] : memref<3x4xf32, #tpu.memory_space<smem>>
    %130 = vector.broadcast %129 : f32 to vector<2x128xf32>
    %131 = arith.mulf %128, %130 : vector<2x128xf32>
    %132 = arith.addf %126, %131 : vector<2x128xf32>
    %c1_130 = arith.constant 1 : index
    %c3_131 = arith.constant 3 : index
    %c0_132 = arith.constant 0 : index
    %c0_133 = arith.constant 0 : index
    %133 = vector.load %arg4[%c1_130, %c3_131, %c0_132, %c0_133] : memref<2x4x2x128xf32, #tpu.memory_space<vmem>>, vector<1x1x2x128xf32>
    %134 = vector.shape_cast %133 : vector<1x1x2x128xf32> to vector<2x128xf32>
    %c1_134 = arith.constant 1 : index
    %c3_135 = arith.constant 3 : index
    %135 = memref.load %arg2[%c1_134, %c3_135] : memref<3x4xf32, #tpu.memory_space<smem>>
    %136 = vector.broadcast %135 : f32 to vector<2x128xf32>
    %137 = arith.mulf %134, %136 : vector<2x128xf32>
    %138 = arith.addf %132, %137 : vector<2x128xf32>
    %c1_136 = arith.constant 1 : index
    %139 = memref.load %arg3[%c1_136] : memref<3xf32, #tpu.memory_space<smem>>
    %140 = vector.broadcast %139 : f32 to vector<2x128xf32>
    %141 = arith.addf %138, %140 : vector<2x128xf32>
    %c1_137 = arith.constant 1 : index
    %c1_138 = arith.constant 1 : index
    %c0_139 = arith.constant 0 : index
    %c0_140 = arith.constant 0 : index
    %142 = vector.load %arg5[%c1_137, %c1_138, %c0_139, %c0_140] : memref<2x3x2x128xf32, #tpu.memory_space<vmem>>, vector<1x1x2x128xf32>
    %143 = vector.shape_cast %142 : vector<1x1x2x128xf32> to vector<2x128xf32>
    %144 = vector.shape_cast %141 : vector<2x128xf32> to vector<1x1x2x128xf32>
    tpu.vector_store %arg5[%c1_137, %c1_138, %c0_139, %c0_140], %144 {strides = array<i32>} : memref<2x3x2x128xf32, #tpu.memory_space<vmem>>, vector<1x1x2x128xf32>,
    %c1_141 = arith.constant 1 : index
    %c0_142 = arith.constant 0 : index
    %c0_143 = arith.constant 0 : index
    %c0_144 = arith.constant 0 : index
    %145 = vector.load %arg4[%c1_141, %c0_142, %c0_143, %c0_144] : memref<2x4x2x128xf32, #tpu.memory_space<vmem>>, vector<1x1x2x128xf32>
    %146 = vector.shape_cast %145 : vector<1x1x2x128xf32> to vector<2x128xf32>
    %c2_145 = arith.constant 2 : index
    %c0_146 = arith.constant 0 : index
    %147 = memref.load %arg2[%c2_145, %c0_146] : memref<3x4xf32, #tpu.memory_space<smem>>
    %148 = vector.broadcast %147 : f32 to vector<2x128xf32>
    %149 = arith.mulf %146, %148 : vector<2x128xf32>
    %c1_147 = arith.constant 1 : index
    %c1_148 = arith.constant 1 : index
    %c0_149 = arith.constant 0 : index
    %c0_150 = arith.constant 0 : index
    %150 = vector.load %arg4[%c1_147, %c1_148, %c0_149, %c0_150] : memref<2x4x2x128xf32, #tpu.memory_space<vmem>>, vector<1x1x2x128xf32>
    %151 = vector.shape_cast %150 : vector<1x1x2x128xf32> to vector<2x128xf32>
    %c2_151 = arith.constant 2 : index
    %c1_152 = arith.constant 1 : index
    %152 = memref.load %arg2[%c2_151, %c1_152] : memref<3x4xf32, #tpu.memory_space<smem>>
    %153 = vector.broadcast %152 : f32 to vector<2x128xf32>
    %154 = arith.mulf %151, %153 : vector<2x128xf32>
    %155 = arith.addf %149, %154 : vector<2x128xf32>
    %c1_153 = arith.constant 1 : index
    %c2_154 = arith.constant 2 : index
    %c0_155 = arith.constant 0 : index
    %c0_156 = arith.constant 0 : index
    %156 = vector.load %arg4[%c1_153, %c2_154, %c0_155, %c0_156] : memref<2x4x2x128xf32, #tpu.memory_space<vmem>>, vector<1x1x2x128xf32>
    %157 = vector.shape_cast %156 : vector<1x1x2x128xf32> to vector<2x128xf32>
    %c2_157 = arith.constant 2 : index
    %c2_158 = arith.constant 2 : index
    %158 = memref.load %arg2[%c2_157, %c2_158] : memref<3x4xf32, #tpu.memory_space<smem>>
    %159 = vector.broadcast %158 : f32 to vector<2x128xf32>
    %160 = arith.mulf %157, %159 : vector<2x128xf32>
    %161 = arith.addf %155, %160 : vector<2x128xf32>
    %c1_159 = arith.constant 1 : index
    %c3_160 = arith.constant 3 : index
    %c0_161 = arith.constant 0 : index
    %c0_162 = arith.constant 0 : index
    %162 = vector.load %arg4[%c1_159, %c3_160, %c0_161, %c0_162] : memref<2x4x2x128xf32, #tpu.memory_space<vmem>>, vector<1x1x2x128xf32>
    %163 = vector.shape_cast %162 : vector<1x1x2x128xf32> to vector<2x128xf32>
    %c2_163 = arith.constant 2 : index
    %c3_164 = arith.constant 3 : index
    %164 = memref.load %arg2[%c2_163, %c3_164] : memref<3x4xf32, #tpu.memory_space<smem>>
    %165 = vector.broadcast %164 : f32 to vector<2x128xf32>
    %166 = arith.mulf %163, %165 : vector<2x128xf32>
    %167 = arith.addf %161, %166 : vector<2x128xf32>
    %c2_165 = arith.constant 2 : index
    %168 = memref.load %arg3[%c2_165] : memref<3xf32, #tpu.memory_space<smem>>
    %169 = vector.broadcast %168 : f32 to vector<2x128xf32>
    %170 = arith.addf %167, %169 : vector<2x128xf32>
    %c1_166 = arith.constant 1 : index
    %c2_167 = arith.constant 2 : index
    %c0_168 = arith.constant 0 : index
    %c0_169 = arith.constant 0 : index
    %171 = vector.load %arg5[%c1_166, %c2_167, %c0_168, %c0_169] : memref<2x3x2x128xf32, #tpu.memory_space<vmem>>, vector<1x1x2x128xf32>
    %172 = vector.shape_cast %171 : vector<1x1x2x128xf32> to vector<2x128xf32>
    %173 = vector.shape_cast %170 : vector<2x128xf32> to vector<1x1x2x128xf32>
    tpu.vector_store %arg5[%c1_166, %c2_167, %c0_168, %c0_169], %173 {strides = array<i32>} : memref<2x3x2x128xf32, #tpu.memory_space<vmem>>, vector<1x1x2x128xf32>,
    return
  }
  func.func @transform_0(%arg0: i32, %arg1: i32) -> (i32, i32) {
    %c0_i32 = arith.constant 0 : i32
    %c0_i32_0 = arith.constant 0 : i32
    %c0_i32_1 = arith.constant 0 : i32
    return %c0_i32, %c0_i32_0 : i32, i32
  }
  func.func @transform_1(%arg0: i32, %arg1: i32) -> i32 {
    %c0_i32 = arith.constant 0 : i32
    %c0_i32_0 = arith.constant 0 : i32
    return %c0_i32 : i32
  }
  func.func @transform_2(%arg0: i32, %arg1: i32) -> (i32, i32, i32, i32) {
    %c0_i32 = arith.constant 0 : i32
    %c0_i32_0 = arith.constant 0 : i32
    %c0_i32_1 = arith.constant 0 : i32
    return %arg0, %c0_i32, %arg1, %c0_i32_0 : i32, i32, i32, i32
  }
  func.func @transform_3(%arg0: i32, %arg1: i32) -> (i32, i32, i32, i32) {
    %c0_i32 = arith.constant 0 : i32
    %c0_i32_0 = arith.constant 0 : i32
    %c0_i32_1 = arith.constant 0 : i32
    return %arg0, %c0_i32, %arg1, %c0_i32_0 : i32, i32, i32, i32
  }
}

</mosaic_0001>

<bundles_post_ra>
// kernel: tpu_custom_call.1
= control target key start
LH: loop header
LB: loop body
LE: loop exit
PB: predicated region body
PF: predicated region fallthrough
CT: control target
= control target key end

     0   :  { %8 = vsyncpa [#allocation5], 0  ;;  %s451_s0 = inlined_call_operand.hbm [shape: f32[3,4], index: 0, kind: input, shape index: {}]   ;;  %s452_s1 = inlined_call_operand.vmem [shape: f32[3], index: 1, kind: input, shape index: {}]   ;;  %s453_s2 = inlined_call_operand.hbm [shape: f32[2,4,2,128], index: 2, kind: input, shape index: {}]   ;;  %s454_s3 = inlined_call_operand.hbm [shape: f32[2,3,2,128], index: 3, kind: output, shape index: {}]  }
   0x1   :  { %9 = vsyncpa [#allocation6], 0 }
   0x2   :  { %10 = vsyncpa [#allocation3], 0 }
   0x3   :  { %11 = vsyncpa [#allocation4], 0  ;;  %s26_s14 = sshll.u32 %s452_s1, 4  ;;  %s253_s17 = scalar_lea.hbm %s451_s0, 64  ;;  %s27_s14 = int_to_ptr.vmem [resolvable:$true] %s26_s14 }
   0x4   :  { %p254_p0 = scmp.ne.s32.totalorder %s451_s0, %s253_s17  ;;  %p257_p1 = scmp.lt.u32.totalorder %s253_s17, %s451_s0 }
   0x6   :  { %p259_p2 = pnand %p257_p1, %p254_p0 }
   0x8   :  { %262 = shalt.err (!%p259_p2)
}
   0x9   :  { %s327_s22 = smov [#allocation2]   ;;  %s263_s1 = scalar_lea.vmem %s27_s14, 16 }
   0xa   :  { %19 = dma.hbm_to_smem %s451_s0, 64, %s327_s22, [#allocation5]  }
   0xb   :  { %p264_p3 = scmp.ne.s32.totalorder %s27_s14, %s263_s1  ;;  %p268_p4 = scmp.lt.s32.totalorder %s27_s14, %s27_s14 }
   0xc   :  { %p269_p5 = scmp.lt.s32.totalorder %s263_s1, %s263_s1 }
   0xe   :  { %p270_p6 = por %p269_p5, %p268_p4 }
  0x10   :  { %p271_p7 = pnand %p270_p6, %p264_p3 }
  0x12   :  { %274 = shalt.err (!%p271_p7)
}
  0x13   :  { %s328_s25 = smov [#allocation7]   ;;  %s329_s26 = smov [#allocation8]  }
  0x14   :  { %29 = dma.vmem_to_smem %s27_s14, 16, %s328_s25, [#allocation6]  }
  0x15   :  { %s35_s27 = sshll.u32 %s329_s26, 4  ;;  %s275_s30 = scalar_lea.hbm %s453_s2, 256  ;;  %s36_s27 = int_to_ptr.vmem [resolvable:$true] %s35_s27 }
  0x16   :  { %p276_p8 = scmp.ne.s32.totalorder %s453_s2, %s275_s30  ;;  %p279_p9 = scmp.lt.u32.totalorder %s275_s30, %s453_s2 }
  0x18   :  { %p281_p10 = pnand %p279_p9, %p276_p8 }
  0x1a   :  { %284 = shalt.err (!%p281_p10)
}
  0x1b   :  { %s285_s7 = scalar_lea.vmem %s36_s27, 256  ;;  %p290_p12 = scmp.lt.s32.totalorder %s36_s27, %s36_s27 }
  0x1c   :  { %p286_p11 = scmp.ne.s32.totalorder %s36_s27, %s285_s7  ;;  %p291_p13 = scmp.lt.s32.totalorder %s285_s7, %s285_s7 }
  0x1e   :  { %p292_p0 = por %p291_p13, %p290_p12 }
  0x20   :  { %p293_p1 = pnand %p292_p0, %p286_p11 }
  0x22   :  { %296 = shalt.err (!%p293_p1)
}
  0x23   :  { %s330_s8 = smov 32   ;;  %s331_s9 = smov 2  }
  0x24   :  { %41 = dma.hbm_to_vmem [thread:$0]  %s453_s2, 256, %s36_s27, [#allocation3], %s330_s8, %s330_s8, %s331_s9  }
  0x25   :  { %319 = dma.done.wait [#allocation5], 64  }
  0x26   :  { %320 = vsyncadd [#allocation5], 4294967232 }
  0x27   :  { %321 = dma.done.wait [#allocation6], 16  }
  0x28   :  { %322 = vsyncadd [#allocation6], 4294967280 }
  0x29   :  { %323 = dma.done.wait [#allocation3], 256  }
  0x2a   :  { %324 = vsyncadd [#allocation3], 4294967040 }
  0x2b   :  { %51 = sfence }
  0x2c   :  { %s383_s12 = sld [smem:[#allocation2]]  ;;  %s385_s13 = sld [smem:[#allocation2 + $0x1]]  ;;  %v52_v0 = vld [vmem:[#allocation8] sm:$0x3]  ;;  %v57_v1 = vld [vmem:[#allocation8 + $0x2] sm:$0x3] }
  0x2d   :  { %s387_s14 = sld [smem:[#allocation2 + $0x2]]  ;;  %s389_s15 = sld [smem:[#allocation2 + $0x3]]  ;;  %v63_v2 = vld [vmem:[#allocation8 + $0x4] sm:$0x3]  ;;  %v69_v4 = vld [vmem:[#allocation8 + $0x6] sm:$0x3] }
  0x2e   :  { %s391_s16 = sld [smem:[#allocation7]]  ;;  %s395_s17 = sld [smem:[#allocation2 + $0x81]]  ;;  %v78_v5 = vld [vmem:[#allocation8] sm:$0x3]  ;;  %v82_v9 = vld [vmem:[#allocation8 + $0x2] sm:$0x3] }
  0x2f   :  { %s393_s2 = sld [smem:[#allocation2 + $0x80]]  ;;  %s397_s18 = sld [smem:[#allocation2 + $0x82]]  ;;  %v87_v13 = vld [vmem:[#allocation8 + $0x4] sm:$0x3]  ;;  %v92_v17 = vld [vmem:[#allocation8 + $0x6] sm:$0x3] }
  0x30   :  { %s399_s19 = sld [smem:[#allocation2 + $0x83]]  ;;  %s401_s20 = sld [smem:[#allocation7 + $0x1]]  ;;  %v127_v18 = vld [vmem:[#allocation8 + $0x8] sm:$0x3]  ;;  %v102_v23 = vld [vmem:[#allocation8] sm:$0x3] }
  0x31   :  { %s404_s21 = sld [smem:[#allocation2 + $0x100]]  ;;  %s408_s22 = sld [smem:[#allocation2 + $0x101]]  ;;  %v106_v28 = vld [vmem:[#allocation8 + $0x2] sm:$0x3]  ;;  %v111_v29 = vld [vmem:[#allocation8 + $0x4] sm:$0x3] }
  0x32   :  { %v54_v3 = vstv %s383_s12  ;;  %v59_v7 = vstv %s385_s13  ;;  %s410_s23 = sld [smem:[#allocation2 + $0x102]]  ;;  %s413_s24 = sld [smem:[#allocation2 + $0x103]]  ;;  %v116_v33 = vld [vmem:[#allocation8 + $0x6] sm:$0x3]  ;;  %v132_v35 = vld [vmem:[#allocation8 + $0xa] sm:$0x3] }
  0x33   :  { %v55_v6 = vmul.f32 %v54_v3, %v52_v0  ;;  %v65_v8 = vstv %s387_s14  ;;  %v60_v10 = vmul.f32 %v59_v7, %v57_v1  ;;  %v71_v12 = vstv %s389_s15  ;;  %s415_s1 = sld [smem:[#allocation7 + $0x2]]  ;;  %v138_v40 = vld [vmem:[#allocation8 + $0xc] sm:$0x3]  ;;  %v144_v41 = vld [vmem:[#allocation8 + $0xe] sm:$0x3]  ;;  %s332_s25 = smov [#allocation9]  }
  0x34   :  { %v66_v11 = vmul.f32 %v65_v8, %v63_v2  ;;  %v72_v14 = vmul.f32 %v71_v12, %v69_v4  ;;  %v75_v15 = vstv %s391_s16  ;;  %v84_v21 = vstv %s395_s17  ;;  %v154_v46 = vld [vmem:[#allocation8 + $0x8] sm:$0x3]  ;;  %v158_v47 = vld [vmem:[#allocation8 + $0xa] sm:$0x3]  ;;  %v163_v52 = vld [vmem:[#allocation8 + $0xc] sm:$0x3] }
  0x35   :  { %v80_v16 = vstv %s393_s2  ;;  %v61_v19 = vadd.f32 %v60_v10, %v55_v6  ;;  %v89_v22 = vstv %s397_s18  ;;  %v85_v24 = vmul.f32 %v84_v21, %v82_v9  ;;  %v168_v53 = vld [vmem:[#allocation8 + $0xe] sm:$0x3]  ;;  %v178_v54 = vld [vmem:[#allocation8 + $0x8] sm:$0x3]  ;;  %v182_v59 = vld [vmem:[#allocation8 + $0xa] sm:$0x3] }
  0x36   :  { %v81_v20 = vmul.f32 %v80_v16, %v78_v5  ;;  %v90_v25 = vmul.f32 %v89_v22, %v87_v13  ;;  %v94_v26 = vstv %s399_s19  ;;  %v98_v27 = vstv %s401_s20  ;;  %v187_v0 = vld [vmem:[#allocation8 + $0xc] sm:$0x3]  ;;  %v192_v5 = vld [vmem:[#allocation8 + $0xe] sm:$0x3]  ;;  %s207_s26 = sshll.u32 %s332_s25, 4  ;;  %s208_s26 = int_to_ptr.vmem [resolvable:$true] %s207_s26 }
  0x37   :  { %v67_v30 = vadd.f32 %v66_v11, %v61_v19  ;;  %v95_v31 = vmul.f32 %v94_v26, %v92_v17  ;;  %v104_v32 = vstv %s404_s21  ;;  %v130_v34 = vmul.f32 %v127_v18, %v54_v3  ;;  %s297_s27 = scalar_lea.vmem %s208_s26, 192  ;;  %p302_p3 = scmp.lt.s32.totalorder %s208_s26, %s208_s26 }
  0x38   :  { %v86_v36 = vadd.f32 %v85_v24, %v81_v20  ;;  %v105_v37 = vmul.f32 %v104_v32, %v102_v23  ;;  %v108_v38 = vstv %s408_s22  ;;  %v113_v39 = vstv %s410_s23  ;;  %p298_p2 = scmp.ne.s32.totalorder %s208_s26, %s297_s27  ;;  %p303_p4 = scmp.lt.s32.totalorder %s297_s27, %s297_s27 }
  0x39   :  { %v73_v42 = vadd.f32 %v72_v14, %v67_v30  ;;  %v109_v43 = vmul.f32 %v108_v38, %v106_v28  ;;  %v114_v44 = vmul.f32 %v113_v39, %v111_v29  ;;  %v118_v45 = vstv %s413_s24 }
  0x3a   :  { %v91_v48 = vadd.f32 %v90_v25, %v86_v36  ;;  %v119_v49 = vmul.f32 %v118_v45, %v116_v33  ;;  %v122_v50 = vstv %s415_s1  ;;  %v135_v51 = vmul.f32 %v132_v35, %v59_v7  ;;  %p304_p5 = por %p303_p4, %p302_p3 }
  0x3b   :  { %v76_v55 = vadd.f32 %v75_v15, %v73_v42  ;;  %v110_v56 = vadd.f32 %v109_v43, %v105_v37  ;;  %v141_v57 = vmul.f32 %v138_v40, %v65_v8  ;;  %v147_v58 = vmul.f32 %v144_v41, %v71_v12 }
  0x3c   :  { %v96_v60 = vadd.f32 %v95_v31, %v91_v48  ;;  %v136_v61 = vadd.f32 %v135_v51, %v130_v34  ;;  %v157_v62 = vmul.f32 %v154_v46, %v80_v16  ;;  %v161_v63 = vmul.f32 %v158_v47, %v84_v21  ;;  %p305_p6 = pnand %p304_p5, %p298_p2 }
  0x3d   :  { %77 = vst [vmem:[#allocation9] sm:$0x3] %v76_v55  ;;  %v115_v1 = vadd.f32 %v114_v44, %v110_v56  ;;  %v166_v2 = vmul.f32 %v163_v52, %v89_v22  ;;  %v171_v3 = vmul.f32 %v168_v53, %v94_v26  ;;  %v181_v4 = vmul.f32 %v178_v54, %v104_v32 }
  0x3e   :  { %v99_v6 = vadd.f32 %v98_v27, %v96_v60  ;;  %v142_v7 = vadd.f32 %v141_v57, %v136_v61  ;;  %v162_v9 = vadd.f32 %v161_v63, %v157_v62  ;;  %v185_v10 = vmul.f32 %v182_v59, %v108_v38 }
  0x3f   :  { %v120_v8 = vadd.f32 %v119_v49, %v115_v1  ;;  %v190_v11 = vmul.f32 %v187_v0, %v113_v39  ;;  %v195_v16 = vmul.f32 %v192_v5, %v118_v45 }
  0x40   :  { %101 = vst [vmem:[#allocation9 + $0x2] sm:$0x3] %v99_v6  ;;  %v148_v12 = vadd.f32 %v147_v58, %v142_v7  ;;  %v167_v13 = vadd.f32 %v166_v2, %v162_v9  ;;  %v186_v14 = vadd.f32 %v185_v10, %v181_v4 }
  0x41   :  { %v123_v17 = vadd.f32 %v122_v50, %v120_v8 }
  0x42   :  { %v151_v18 = vadd.f32 %v148_v12, %v75_v15  ;;  %v172_v19 = vadd.f32 %v171_v3, %v167_v13  ;;  %v191_v20 = vadd.f32 %v190_v11, %v186_v14 }
  0x43   :  { %125 = vst [vmem:[#allocation9 + $0x4] sm:$0x3] %v123_v17 }
  0x44   :  { %153 = vst [vmem:[#allocation9 + $0x6] sm:$0x3] %v151_v18  ;;  %v175_v21 = vadd.f32 %v172_v19, %v98_v27  ;;  %v196_v22 = vadd.f32 %v195_v16, %v191_v20 }
  0x46   :  { %177 = vst [vmem:[#allocation9 + $0x8] sm:$0x3] %v175_v21  ;;  %v199_v23 = vadd.f32 %v196_v22, %v122_v50 }
  0x48   :  { %201 = vst [vmem:[#allocation9 + $0xa] sm:$0x3] %v199_v23 }
  0x49   :  { %308 = shalt.err (!%p305_p6)
}
  0x4a   :  { %s309_s30 = scalar_lea.hbm %s454_s3, 192 }
  0x4b   :  { %p310_p7 = scmp.ne.s32.totalorder %s454_s3, %s309_s30  ;;  %p313_p8 = scmp.lt.u32.totalorder %s309_s30, %s454_s3 }
  0x4d   :  { %p315_p9 = pnand %p313_p8, %p310_p7 }
  0x4f   :  { %318 = shalt.err (!%p315_p9)
}
  0x50   :  { %213 = dma.vmem_to_hbm [thread:$0]  %s208_s26, 192, %s454_s3, [#allocation4], %s330_s8, %s330_s8, %s331_s9  }
  0x51   :  { %325 = dma.done.wait [#allocation4], 192  }
  0x52   :  { %326 = vsyncadd [#allocation4], 4294967104 }
  0x53   :  { %217 = vsyncpa [#allocation3], 1 }
  0x54   :  { %218 = vsyncpa [#allocation4], 1 }
  0x55   :  { %219 = vsyncpa [#allocation5], 1 }
  0x56   :  { %220 = vsyncpa [#allocation6], 1 }

</bundles_post_ra>
